<compile_context>
chip_gen: v6e
topology: v6e:2x2x1
jax: 0.10.0
libtpu: 0.0.40
codegen_flags: <defaults>
</compile_context>

<pallas_src>
import functools

import jax
import jax.numpy as jnp
from jax.experimental import pallas as pl
from jax.experimental.pallas import tpu as pltpu


def _embed_gather_kernel(idx_ref, w_hbm_ref, o_ref, row_buf, copy_sem, *, tpb):
    # idx_ref  : SMEM (n_pad,) int32   token ids (scalar prefetch)
    # w_hbm_ref: HBM  (vocab, E)       embedding table, never copied wholesale
    # o_ref    : VMEM (tpb, E)         output tile (auto-pipelined writeback)
    # row_buf  : VMEM (tpb, E)         gather staging tile
    # copy_sem : DMA semaphore shared by all row copies of this step
    base = pl.program_id(0) * tpb

    # Issue all TPB row DMAs up front so the DMA engine has the whole tile's
    # transfers in flight (hides per-descriptor latency of small row copies).
    @pl.loop(0, tpb)
    def _issue(t):
        row = idx_ref[base + t]
        pltpu.make_async_copy(
            w_hbm_ref.at[pl.ds(row, 1), :],
            row_buf.at[pl.ds(t, 1), :],
            copy_sem,
        ).start()

    # One wait per issued copy (all copies share `copy_sem` and have equal
    # size, so the descriptor below accounts for exactly one row each).
    @pl.loop(0, tpb)
    def _drain(_):
        pltpu.make_async_copy(
            w_hbm_ref.at[pl.ds(0, 1), :],
            row_buf.at[pl.ds(0, 1), :],
            copy_sem,
        ).wait()

    # Single dense full-tile store; the HBM writeback of this block overlaps
    # the next grid step's gather DMAs via the output double buffer.
    o_ref[...] = row_buf[...]


def embed(W, x, *, tokens_per_block=256):
    """Pallas equivalent of PyTorch `self.W[x]` (exact row gather)."""
    vocab, E = W.shape
    orig_shape = x.shape

    # Flatten indices; wrap negatives like PyTorch (W[-1] == last row), then
    # clamp any remaining out-of-range value so the HBM DMA cannot fault.
    idx = x.reshape(-1).astype(jnp.int32)
    idx = jnp.where(idx < 0, idx + vocab, idx)
    idx = jnp.clip(idx, 0, vocab - 1)
    n = idx.shape[0]

    # Tokens per grid step: multiple of 8 (sublane), capped by the request and
    # by the (8-rounded) token count so tiny inputs don't over-pad.
    tpb_req = max(8, (tokens_per_block // 8) * 8)
    n8 = ((n + 7) // 8) * 8
    tpb = min(tpb_req, n8)

    n_pad = pl.cdiv(n, tpb) * tpb
    if n_pad != n:
        # Padded slots gather row 0 and are sliced off afterwards.
        idx = jnp.pad(idx, (0, n_pad - n))
    num_tiles = n_pad // tpb

    grid_spec = pltpu.PrefetchScalarGridSpec(
        num_scalar_prefetch=1,                 # idx -> SMEM
        grid=(num_tiles,),
        in_specs=[
            # Embedding table stays in HBM; rows are DMA-gathered on demand,
            # so there is no resident-table VMEM ceiling on any generation.
            pl.BlockSpec(memory_space=pl.ANY),
        ],
        out_specs=pl.BlockSpec((tpb, E), lambda i, idx_ref: (i, 0)),
        scratch_shapes=[
            pltpu.VMEM((tpb, E), W.dtype),     # gather staging tile
            pltpu.SemaphoreType.DMA,           # shared row-copy semaphore
        ],
    )

    # VMEM actually needed: staging tile + double-buffered output tile (+ slack).
    tile_bytes = tpb * E * jnp.dtype(W.dtype).itemsize
    vmem_limit = int(min(64 << 20, max(8 << 20, 4 * tile_bytes)))

    kernel = functools.partial(_embed_gather_kernel, tpb=tpb)

    out = pl.pallas_call(
        kernel,
        out_shape=jax.ShapeDtypeStruct((n_pad, E), W.dtype),
        grid_spec=grid_spec,
        compiler_params=pltpu.CompilerParams(
            # Tiles are fully independent -> shard across v7x's 2 TensorCores.
            dimension_semantics=("parallel",),
            vmem_limit_bytes=vmem_limit,
        ),
    )(idx, W)

    if n_pad != n:
        out = out[:n]
    return out.reshape(*orig_shape, E)


if __name__ == "__main__":
    key = jax.random.PRNGKey(0)
    k_w, k_x = jax.random.split(key)

    vocab_size = 64
    embed_size = 128
    batch, seq = 2, 8

    # nn.Parameter(torch.Tensor(V, E)) is a (V, E) float32 weight; use a fixed
    # normal draw for determinism.
    W = jax.random.normal(k_w, (vocab_size, embed_size), dtype=jnp.float32)
    x = jax.random.randint(k_x, (batch, seq), 0, vocab_size, dtype=jnp.int32)

    out = jax.block_until_ready(embed(W, x))

    # Reference: plain-JAX gather (same semantics as W[x] for these indices).
    ref = jnp.take(W, x, axis=0)
    assert out.shape == (batch, seq, embed_size)
    assert out.dtype == W.dtype
    # DMA gather is an exact copy -> bitwise equality.
    assert jnp.array_equal(out, ref), "mismatch vs reference embedding lookup"

    print("KERNEL_OK")
</pallas_src>

<mosaic_0001>
module attributes {stable_mosaic.version = 11 : i64} {
  func.func @_embed_gather_kernel(%arg0: i32, %arg1: memref<16xi32, #tpu.memory_space<smem>>, %arg2: memref<64x128xf32, #tpu.memory_space<any>>, %arg3: memref<16x128xf32, #tpu.memory_space<vmem>>, %arg4: memref<16x128xf32, #tpu.memory_space<vmem>>, %arg5: memref<!tpu.dma_semaphore, #tpu.memory_space<semaphore_mem>>) attributes {dimension_semantics = [#tpu.dimension_semantics<parallel>], iteration_bounds = array<i64: 1>, scalar_prefetch = 1 : i64, scratch_operands = 2 : i64, tpu.core_type = #tpu.core_type<tc>, window_params = [{}, {transform_indices = @transform_1, window_bounds = array<i64: 16, 128>}]} {
    %c16_i32 = arith.constant 16 : i32
    %0 = arith.muli %arg0, %c16_i32 : i32
    %c0_i32 = arith.constant 0 : i32
    %c16_i32_0 = arith.constant 16 : i32
    %1 = arith.addi %c0_i32, %c16_i32_0 : i32
    %c1_i32 = arith.constant 1 : i32
    scf.for %arg6 = %c0_i32 to %1 step %c1_i32  : i32 {
      %c1_i32_8 = arith.constant 1 : i32
      %5 = arith.muli %arg6, %c1_i32_8 : i32
      %c0_i32_9 = arith.constant 0 : i32
      %6 = arith.addi %c0_i32_9, %5 : i32
      %7 = arith.addi %0, %6 : i32
      %8 = arith.index_cast %7 : i32 to index
      %9 = memref.load %arg1[%8] : memref<16xi32, #tpu.memory_space<smem>>
      %c0_i32_10 = arith.constant 0 : i32
      %10 = tpu.memref_slice %arg2[%9, %c0_i32_10] : memref<64x128xf32, #tpu.memory_space<any>> -> memref<1x128xf32, #tpu.memory_space<any>>
      %c0_i32_11 = arith.constant 0 : i32
      %11 = tpu.memref_slice %arg4[%6, %c0_i32_11] : memref<16x128xf32, #tpu.memory_space<vmem>> -> memref<1x128xf32, #tpu.memory_space<vmem>>
      tpu.enqueue_dma source(%10 : memref<1x128xf32, #tpu.memory_space<any>>) target(%11 : memref<1x128xf32, #tpu.memory_space<vmem>>) target_semaphore(%arg5 : memref<!tpu.dma_semaphore, #tpu.memory_space<semaphore_mem>>)
    }
    %c16_i32_1 = arith.constant 16 : i32
    %c0_i32_2 = arith.constant 0 : i32
    %c16_i32_3 = arith.constant 16 : i32
    %2 = arith.addi %c0_i32_2, %c16_i32_3 : i32
    %c1_i32_4 = arith.constant 1 : i32
    scf.for %arg6 = %c0_i32_2 to %2 step %c1_i32_4  : i32 {
      %c0_i32_8 = arith.constant 0 : i32
      %c0_i32_9 = arith.constant 0 : i32
      %5 = tpu.memref_slice %arg2[%c0_i32_8, %c0_i32_9] : memref<64x128xf32, #tpu.memory_space<any>> -> memref<1x128xf32, #tpu.memory_space<any>>
      %c0_i32_10 = arith.constant 0 : i32
      %c0_i32_11 = arith.constant 0 : i32
      %6 = tpu.memref_slice %arg4[%c0_i32_10, %c0_i32_11] : memref<16x128xf32, #tpu.memory_space<vmem>> -> memref<1x128xf32, #tpu.memory_space<vmem>>
      tpu.wait_dma2 semaphore(%arg5 : memref<!tpu.dma_semaphore, #tpu.memory_space<semaphore_mem>>) src(%5 : memref<1x128xf32, #tpu.memory_space<any>>) dst(%6 : memref<1x128xf32, #tpu.memory_space<vmem>>)
    }
    %c0 = arith.constant 0 : index
    %c0_5 = arith.constant 0 : index
    %3 = vector.load %arg4[%c0, %c0_5] : memref<16x128xf32, #tpu.memory_space<vmem>>, vector<16x128xf32>
    %c0_6 = arith.constant 0 : index
    %c0_7 = arith.constant 0 : index
    %4 = vector.load %arg3[%c0_6, %c0_7] : memref<16x128xf32, #tpu.memory_space<vmem>>, vector<16x128xf32>
    tpu.vector_store %arg3[%c0_6, %c0_7], %3 {strides = array<i32>} : memref<16x128xf32, #tpu.memory_space<vmem>>, vector<16x128xf32>,
    return
  }
  func.func @transform_1(%arg0: i32, %arg1: memref<16xi32, #tpu.memory_space<smem>>) -> (i32, i32) {
    %c0_i32 = arith.constant 0 : i32
    %c0_i32_0 = arith.constant 0 : i32
    return %arg0, %c0_i32 : i32, i32
  }
}

</mosaic_0001>

<bundles_post_ra>
// kernel: tpu_custom_call.1
= control target key start
LH: loop header
LB: loop body
LE: loop exit
PB: predicated region body
PF: predicated region fallthrough
CT: control target
= control target key end

     0   :  { %s177_s9 = smov [#allocation5]   ;;  %s222_s0 = inlined_call_operand.hbm [shape: s32[16], index: 0, kind: input, shape index: {}]   ;;  %s223_s1 = inlined_call_operand.hbm [shape: f32[64,128], index: 1, kind: input, shape index: {}]   ;;  %s224_s2 = inlined_call_operand.hbm [shape: f32[16,128], index: 2, kind: output, shape index: {}]  }
   0x1   :  { %8 = dma.hbm_to_smem %s222_s0, 16, %s177_s9, [#allocation4] }
   0x2   :  { %163 = dma.done.wait [#allocation4], 16 }
   0x3   :  { %164 = vsyncadd [#allocation4], 4294967280 }
   0x4   :  { %10 = sfence }
   0x5   :  { %11 = vsyncpa [#allocation7], 0  ;;  %s200_s12 = smov 0  }
   0x6 LB: > { %s20_s13 = sld [smem:[#allocation5 + %s171_s12]]  ;;  %s23_s14 = scalar_lea.vmem [#allocation2], %s171_s12  ;;  %s171_s12 = sphi %s200_s12, %s18_s12  }
   0x7   : > { %s31_s15 = sshll.u32 %s23_s14, 4  ;;  %s115_s22 = scalar_lea.hbm %s223_s1, 1024  ;;  %s32_s15 = int_to_ptr.vmem [resolvable:$true] %s31_s15 }
   0xc   : > { %s83_s16 = sshll.u32 %s20_s13, 4 }
   0xd   : > { %s22_s18 = scalar_lea.hbm %s223_s1, %s83_s16 }
   0xe   : > { %s113_s19 = scalar_lea.hbm %s22_s18, 16  ;;  %p116_p1 = scmp.lt.s32.totalorder %s22_s18, %s223_s1 }
   0xf   : > { %p114_p0 = scmp.ne.s32.totalorder %s22_s18, %s113_s19  ;;  %p117_p2 = scmp.lt.s32.totalorder %s115_s22, %s113_s19 }
  0x11   : > { %p118_p3 = por %p117_p2, %p116_p1 }
  0x13   : > { %p119_p4 = pnand %p118_p3, %p114_p0 }
  0x15   : > { %122 = shalt.err (!%p119_p4)  }
  0x16   : > { %s123_s25 = scalar_lea.vmem %s32_s15, 16  ;;  %s178_s26 = smov [#allocation2]  }
  0x17   : > { %p124_p5 = scmp.ne.s32.totalorder %s32_s15, %s123_s25  ;;  %s125_s27 = sshll.u32 %s178_s26, 4  ;;  %s126_s27 = int_to_ptr.vmem [resolvable:$false] %s125_s27 }
  0x18   : > { %s127_s28 = scalar_lea.vmem %s126_s27, 256  ;;  %p128_p6 = scmp.lt.s32.totalorder %s32_s15, %s126_s27 }
  0x19   : > { %p129_p7 = scmp.lt.s32.totalorder %s127_s28, %s123_s25 }
  0x1b   : > { %p130_p8 = por %p129_p7, %p128_p6 }
  0x1d   : > { %p131_p9 = pnand %p130_p8, %p124_p5 }
  0x1f   : > { %134 = shalt.err (!%p131_p9)  }
  0x20   : > { %34 = dma.hbm_to_vmem [thread:$0]  %s22_s18, 16, %s32_s15, [#allocation3] }
  0x21   : > { %s18_s12 = sadd.s32 1, %s171_s12  }
  0x22   : > { %p15_p10 = scmp.ge.s32.totalorder %s18_s12, 16  }
  0x23   :  { %s173_s29 = smov (%p15_p10), 0  }
  0x24   :  { %17 = sbr.rel (!%p15_p10) target bundleno = 6 (0x6), region = 40 }
  0x29 LB: > { %165 = dma.done.wait [#allocation3], 16  ;;  %s175_s29 = sphi %s173_s29, %s40_s29  }
  0x2a   : > { %166 = vsyncadd [#allocation3], 4294967280  ;;  %s40_s29 = sadd.s32 1, %s175_s29  }
  0x2b   : > { %p37_p11 = scmp.ge.s32.totalorder %s40_s29, 16  }
  0x2c   :  { %v44_v0 = vld [vmem:[#allocation2] sm:$0xff] (%p37_p11)  ;;  %v45_v1 = vld [vmem:[#allocation2 + $0x8] sm:$0xff] (%p37_p11)  ;;  %s179_s30 = smov (%p37_p11), [#allocation6]  }
  0x2d   :  { %39 = sbr.rel (!%p37_p11) target bundleno = 41 (0x29), region = 51  ;;  %46 = vst [vmem:[#allocation6] sm:$0xff] (%p37_p11), %v44_v0  ;;  %47 = vst [vmem:[#allocation6 + $0x8] sm:$0xff] (%p37_p11), %v45_v1  ;;  %s53_s3 = sshll.u32 (%p37_p11), %s179_s30, 4  ;;  %s54_s3 = int_to_ptr.vmem [resolvable:$true] %s53_s3 }
  0x2e   :  { %s135_s4 = scalar_lea.vmem (%p37_p11), %s54_s3, 256  ;;  %p140_p13 = scmp.lt.s32.totalorder (%p37_p11), %s54_s3, %s54_s3 }
  0x2f   :  { %p136_p12 = scmp.ne.s32.totalorder (%p37_p11), %s54_s3, %s135_s4  ;;  %p141_p0 = scmp.lt.s32.totalorder (%p37_p11), %s135_s4, %s135_s4 }
  0x31   :  { %p142_p1 = por (%p37_p11), %p141_p0, %p140_p13 }
  0x33   :  { %p143_p2 = pnand %p142_p1, %p136_p12 }
  0x35   :  { %146 = shalt.err (!%p143_p2)
}
  0x36   :  { %s180_s1 = smov 128   ;;  %s181_s5 = smov 8  }
  0x37   :  { %59 = dma.vmem_to_hbm [thread:$0]  %s54_s3, 256, %s224_s2, [#allocation7], %s180_s1, %s180_s1, %s181_s5  }
  0x38   :  { %167 = dma.done.wait [#allocation7], 256  }
  0x39   :  { %168 = vsyncadd [#allocation7], 4294967040 }
  0x3a   :  { %63 = vsyncpa [#allocation7], 1 }
  0x3b   :  { %64 = vsyncmov [#allocation3] }
  0x3e   :  { %s65_s8 = vpop.sfrf %64 }
  0x3f   :  { %p84_p3 = scmp.ne.s32.totalorder %s65_s8, 0 }
  0x41   :  { %69 = shalt.err (%p84_p3)  }

</bundles_post_ra>
